<compile_context>
chip_gen: v7x
topology: tpu7x:2x2x1
jax: 0.10.0
libtpu: 0.0.40
codegen_flags: <defaults>
</compile_context>

<pallas_src>
import functools

import jax
import jax.numpy as jnp
from jax.experimental import pallas as pl
from jax.experimental.pallas import tpu as pltpu


# ---------------------------------------------------------------------------
# Fused kernel: 2 MXU passes + masked softmax + one unmasked packed store
# ---------------------------------------------------------------------------

def _full_model_kernel(x_ref, w1_ref, b1_ref, w2_ref, b2_ref, out_ref,
                       *, repr_dim, n_opp, n_agent):
    f32 = jnp.float32
    bf16 = jnp.bfloat16

    # ---- fused layer 1: [game | opponent | actor] hidden blocks -------------
    x = x_ref[...].astype(bf16)                                   # (tb, d_in)
    h = jnp.dot(x, w1_ref[...], preferred_element_type=f32) + b1_ref[...]
    h = jnp.maximum(h, 0.0).astype(bf16)                          # (tb, 3H)

    # ---- fused block-diagonal layer 2: packed head -------------------------
    # column layout: [next_repr | opp_logits | agent_logits | value | zero pad]
    head = jnp.dot(h, w2_ref[...], preferred_element_type=f32) + b2_ref[...]

    # lane-index masks for the two softmax regions (static bounds)
    col = jax.lax.broadcasted_iota(jnp.int32, head.shape, 1)
    opp_lo, opp_hi = repr_dim, repr_dim + n_opp
    ag_lo, ag_hi = opp_hi, opp_hi + n_agent
    in_opp = (col >= opp_lo) & (col < opp_hi)
    in_agent = (col >= ag_lo) & (col < ag_hi)

    neg = jnp.float32(-1e30)

    # opponent softmax over its lanes only (exact divide for torch parity)
    o_shift = jnp.where(in_opp, head, neg)
    o_shift = o_shift - jnp.max(o_shift, axis=-1, keepdims=True)
    o_e = jnp.exp(o_shift)                                        # masked lanes -> 0
    o_probs = o_e / jnp.sum(o_e, axis=-1, keepdims=True)

    # agent softmax over its lanes only
    a_shift = jnp.where(in_agent, head, neg)
    a_shift = a_shift - jnp.max(a_shift, axis=-1, keepdims=True)
    a_e = jnp.exp(a_shift)
    a_probs = a_e / jnp.sum(a_e, axis=-1, keepdims=True)

    # next_repr / value / pad lanes come straight from head (pad lanes are 0 by
    # construction of the fused weights); one full-width unmasked store.
    out = jnp.where(in_opp, o_probs, jnp.where(in_agent, a_probs, head))
    out_ref[...] = out.astype(out_ref.dtype)


# ---------------------------------------------------------------------------
# FullModel forward (single pallas_call)
# ---------------------------------------------------------------------------

def full_model_forward(fused, obs, agent_action_onehot, opponent_action_onehot,
                       *, repr_dim, n_opp, n_agent):
    w1, b1, w2, b2 = fused["w1"], fused["b1"], fused["w2"], fused["b2"]
    B = obs.shape[0]
    d_in = w1.shape[0]
    d_hid = w1.shape[1]          # 3 * hidden
    pack = w2.shape[1]           # lane-dense packed output width (multiple of 128)

    # fold the game-model concat into one activation tensor (single input ref)
    x = jnp.concatenate(
        [obs, agent_action_onehot, opponent_action_onehot], axis=-1
    ).astype(jnp.float32)

    # batch tiling: pad to a multiple of 16 (bf16 sublane packing). Small batches
    # run as one tile (single-TC v5e/v6e: amortize the ~0.35us per-step cost);
    # large batches use 512-row tiles so nb >= 2 and v7x can shard the parallel
    # axis across its two TensorCores.
    b_pad = ((B + 15) // 16) * 16
    if b_pad <= 512:
        tb = b_pad
    else:
        tb = 512
        b_pad = ((b_pad + tb - 1) // tb) * tb
    nb = b_pad // tb
    if b_pad != B:
        x = jnp.pad(x, ((0, b_pad - B), (0, 0)))

    kernel = functools.partial(_full_model_kernel,
                               repr_dim=repr_dim, n_opp=n_opp, n_agent=n_agent)

    flops = 2 * b_pad * (d_in * d_hid + d_hid * pack)
    transcendentals = b_pad * (n_opp + n_agent)
    bytes_accessed = (x.size * 4 + w1.size * 2 + b1.size * 4
                      + w2.size * 2 + b2.size * 4 + b_pad * pack * 4)

    packed = pl.pallas_call(
        kernel,
        out_shape=jax.ShapeDtypeStruct((b_pad, pack), jnp.float32),
        grid=(nb,),
        in_specs=[
            pl.BlockSpec((tb, d_in), lambda i: (i, 0)),       # activations
            pl.BlockSpec(w1.shape, lambda i: (0, 0)),         # fused W1 (bf16)
            pl.BlockSpec(b1.shape, lambda i: (0, 0)),         # fused b1 (f32)
            pl.BlockSpec(w2.shape, lambda i: (0, 0)),         # fused W2 (bf16)
            pl.BlockSpec(b2.shape, lambda i: (0, 0)),         # fused b2 (f32)
        ],
        out_specs=pl.BlockSpec((tb, pack), lambda i: (i, 0)),
        compiler_params=pltpu.CompilerParams(dimension_semantics=("parallel",)),
        cost_estimate=pl.CostEstimate(flops=flops,
                                      transcendentals=transcendentals,
                                      bytes_accessed=bytes_accessed),
    )(x, w1, b1, w2, b2)

    off = 0
    next_obs_representation = packed[:B, off:off + repr_dim]; off += repr_dim
    opponent_action_probabilities = packed[:B, off:off + n_opp]; off += n_opp
    agent_action_probabilities = packed[:B, off:off + n_agent]; off += n_agent
    obs_value = packed[:B, off:off + 1]

    return (next_obs_representation, opponent_action_probabilities,
            agent_action_probabilities, obs_value)


# ---------------------------------------------------------------------------
# Per-module params (mirrors the PyTorch structure) + one-time fusion
# ---------------------------------------------------------------------------

def init_params(key, obs_dim, n_agent_actions, n_opp_actions, hidden, repr_dim):
    ks = jax.random.split(key, 12)

    def lin(kw, fan_in, fan_out):
        return (jax.random.normal(kw, (fan_in, fan_out), jnp.float32)
                / jnp.sqrt(fan_in)).astype(jnp.bfloat16)

    def bias(kb, fan_out):
        return jax.random.normal(kb, (1, fan_out), jnp.float32) * 0.01

    d_cat = obs_dim + n_agent_actions + n_opp_actions
    gm = {"w1": lin(ks[0], d_cat, hidden), "b1": bias(ks[1], hidden),
          "w2": lin(ks[2], hidden, repr_dim), "b2": bias(ks[3], repr_dim)}
    om = {"w1": lin(ks[4], obs_dim, hidden), "b1": bias(ks[5], hidden),
          "w2": lin(ks[6], hidden, n_opp_actions), "b2": bias(ks[7], n_opp_actions)}
    ac = {"wt": lin(ks[8], obs_dim, hidden), "bt": bias(ks[9], hidden),
          "wa": lin(ks[10], hidden, n_agent_actions),
          "ba": jnp.zeros((1, n_agent_actions), jnp.float32),
          "wv": lin(ks[11], hidden, 1),
          "bv": jnp.zeros((1, 1), jnp.float32)}
    return {"game_model": gm, "opponent_model": om, "actor_critic": ac}


def fuse_params(params, obs_dim, n_agent_actions, n_opp_actions):
    """Column-fuse layer 1 and block-diagonalize layer 2 (done once, outside jit)."""
    f32 = jnp.float32
    gm, om, ac = params["game_model"], params["opponent_model"], params["actor_critic"]
    hidden = gm["b1"].shape[1]
    repr_dim = gm["w2"].shape[1]
    n_opp = om["w2"].shape[1]
    n_agent = ac["wa"].shape[1]
    d_in = obs_dim + n_agent_actions + n_opp_actions
    total = repr_dim + n_opp + n_agent + 1
    pack = max(128, ((total + 127) // 128) * 128)

    # Layer 1: [game | opponent | actor] column blocks. The opponent / actor
    # blocks only read the obs rows (action rows stay zero == they ignore actions).
    w1 = jnp.zeros((d_in, 3 * hidden), f32)
    w1 = w1.at[:, 0:hidden].set(gm["w1"].astype(f32))
    w1 = w1.at[:obs_dim, hidden:2 * hidden].set(om["w1"].astype(f32))
    w1 = w1.at[:obs_dim, 2 * hidden:3 * hidden].set(ac["wt"].astype(f32))
    b1 = jnp.concatenate([gm["b1"], om["b1"], ac["bt"]], axis=1).astype(f32)

    # Layer 2: block-diagonal, column order == packed output layout
    # [next_repr | opp_logits | agent_logits | value | zero pad].
    c0, c1, c2, c3 = 0, repr_dim, repr_dim + n_opp, repr_dim + n_opp + n_agent
    w2 = jnp.zeros((3 * hidden, pack), f32)
    w2 = w2.at[0:hidden, c0:c1].set(gm["w2"].astype(f32))
    w2 = w2.at[hidden:2 * hidden, c1:c2].set(om["w2"].astype(f32))
    w2 = w2.at[2 * hidden:3 * hidden, c2:c3].set(ac["wa"].astype(f32))
    w2 = w2.at[2 * hidden:3 * hidden, c3:c3 + 1].set(ac["wv"].astype(f32))
    b2 = jnp.zeros((1, pack), f32)
    b2 = b2.at[:, c0:c1].set(gm["b2"])
    b2 = b2.at[:, c1:c2].set(om["b2"])
    b2 = b2.at[:, c2:c3].set(ac["ba"])
    b2 = b2.at[:, c3:c3 + 1].set(ac["bv"])

    return {"w1": w1.astype(jnp.bfloat16), "b1": b1,
            "w2": w2.astype(jnp.bfloat16), "b2": b2}


# ---------------------------------------------------------------------------
# Pure-JAX unfused reference (same bf16/f32 numerics) for correctness check
# ---------------------------------------------------------------------------

def reference_forward(params, obs, a1h, o1h):
    f32, bf16 = jnp.float32, jnp.bfloat16
    gm, om, ac = params["game_model"], params["opponent_model"], params["actor_critic"]

    x_g = jnp.concatenate([obs, a1h, o1h], axis=-1).astype(bf16)
    gh = jnp.maximum(jnp.dot(x_g, gm["w1"], preferred_element_type=f32) + gm["b1"], 0.0)
    next_repr = jnp.dot(gh.astype(bf16), gm["w2"], preferred_element_type=f32) + gm["b2"]

    obs_b = obs.astype(bf16)
    oh = jnp.maximum(jnp.dot(obs_b, om["w1"], preferred_element_type=f32) + om["b1"], 0.0)
    opp_probs = jax.nn.softmax(
        jnp.dot(oh.astype(bf16), om["w2"], preferred_element_type=f32) + om["b2"], axis=-1)

    th = jnp.maximum(jnp.dot(obs_b, ac["wt"], preferred_element_type=f32) + ac["bt"], 0.0)
    th = th.astype(bf16)
    agent_probs = jax.nn.softmax(
        jnp.dot(th, ac["wa"], preferred_element_type=f32) + ac["ba"], axis=-1)
    value = jnp.dot(th, ac["wv"], preferred_element_type=f32) + ac["bv"]
    return next_repr, opp_probs, agent_probs, value


# ---------------------------------------------------------------------------
# Example run
# ---------------------------------------------------------------------------

if __name__ == "__main__":
    B = 8              # batch
    OBS_DIM = 32       # flat observation features
    N_AGENT_ACT = 8    # agent action one-hot size
    N_OPP_ACT = 8      # opponent action one-hot size
    HIDDEN = 64
    REPR_DIM = 32      # next-obs representation dim

    key = jax.random.PRNGKey(0)
    k_obs, k_aa, k_oa, k_params = jax.random.split(key, 4)

    obs = jax.random.normal(k_obs, (B, OBS_DIM), jnp.float32)
    agent_action_onehot = jax.nn.one_hot(
        jax.random.randint(k_aa, (B,), 0, N_AGENT_ACT), N_AGENT_ACT, dtype=jnp.float32)
    opponent_action_onehot = jax.nn.one_hot(
        jax.random.randint(k_oa, (B,), 0, N_OPP_ACT), N_OPP_ACT, dtype=jnp.float32)

    params = init_params(k_params, OBS_DIM, N_AGENT_ACT, N_OPP_ACT, HIDDEN, REPR_DIM)
    fused = fuse_params(params, OBS_DIM, N_AGENT_ACT, N_OPP_ACT)

    forward = jax.jit(functools.partial(
        full_model_forward, repr_dim=REPR_DIM, n_opp=N_OPP_ACT, n_agent=N_AGENT_ACT))
    outs = jax.block_until_ready(
        forward(fused, obs, agent_action_onehot, opponent_action_onehot))
    next_repr, opp_probs, agent_probs, value = outs

    # shape / sanity checks
    assert next_repr.shape == (B, REPR_DIM)
    assert opp_probs.shape == (B, N_OPP_ACT)
    assert agent_probs.shape == (B, N_AGENT_ACT)
    assert value.shape == (B, 1)
    assert jnp.allclose(jnp.sum(opp_probs, axis=-1), 1.0, atol=1e-3)
    assert jnp.allclose(jnp.sum(agent_probs, axis=-1), 1.0, atol=1e-3)
    assert bool(jnp.all(jnp.isfinite(next_repr)))
    assert bool(jnp.all(jnp.isfinite(value)))

    # parity with the unfused per-module reference (same bf16 weights, f32 accum)
    ref = reference_forward(params, obs, agent_action_onehot, opponent_action_onehot)
    for got, want in zip(outs, ref):
        assert jnp.allclose(got, want, atol=5e-3, rtol=5e-3)

    print("KERNEL_OK")
</pallas_src>

<mosaic_0001>
module attributes {stable_mosaic.version = 11 : i64} {
  func.func @_full_model_kernel(%arg0: i32, %arg1: memref<16x48xf32, #tpu.memory_space<vmem>>, %arg2: memref<48x192xbf16, #tpu.memory_space<vmem>>, %arg3: memref<1x192xf32, #tpu.memory_space<vmem>>, %arg4: memref<192x128xbf16, #tpu.memory_space<vmem>>, %arg5: memref<1x128xf32, #tpu.memory_space<vmem>>, %arg6: memref<16x128xf32, #tpu.memory_space<vmem>>) attributes {dimension_semantics = [#tpu.dimension_semantics<parallel>], iteration_bounds = array<i64: 1>, scalar_prefetch = 0 : i64, scratch_operands = 0 : i64, tpu.core_type = #tpu.core_type<tc>, window_params = [{transform_indices = @transform_0, window_bounds = array<i64: 16, 48>}, {pipeline_mode = #tpu.pipeline_mode<synchronous>, transform_indices = @transform_1, window_bounds = array<i64: 48, 192>}, {pipeline_mode = #tpu.pipeline_mode<synchronous>, transform_indices = @transform_2, window_bounds = array<i64: 1, 192>}, {pipeline_mode = #tpu.pipeline_mode<synchronous>, transform_indices = @transform_3, window_bounds = array<i64: 192, 128>}, {pipeline_mode = #tpu.pipeline_mode<synchronous>, transform_indices = @transform_4, window_bounds = array<i64: 1, 128>}, {transform_indices = @transform_5, window_bounds = array<i64: 16, 128>}]} {
    %c0 = arith.constant 0 : index
    %c0_0 = arith.constant 0 : index
    %0 = vector.load %arg1[%c0, %c0_0] : memref<16x48xf32, #tpu.memory_space<vmem>>, vector<16x48xf32>
    %1 = arith.truncf %0 : vector<16x48xf32> to vector<16x48xbf16>
    %c0_1 = arith.constant 0 : index
    %c0_2 = arith.constant 0 : index
    %2 = vector.load %arg2[%c0_1, %c0_2] : memref<48x192xbf16, #tpu.memory_space<vmem>>, vector<48x192xbf16>
    %cst = arith.constant dense<0.000000e+00> : vector<16x192xf32>
    %3 = tpu.matmul %1, %2, %cst {dimension_numbers = #tpu.dot_dimension_numbers<[1], [0], [0], [1], [0, 0, 1, 1], [], []>} : vector<16x48xbf16>, vector<48x192xbf16>, vector<16x192xf32> -> vector<16x192xf32>
    %c0_3 = arith.constant 0 : index
    %c0_4 = arith.constant 0 : index
    %4 = vector.load %arg3[%c0_3, %c0_4] : memref<1x192xf32, #tpu.memory_space<vmem>>, vector<1x192xf32>
    %5 = vector.broadcast %4 : vector<1x192xf32> to vector<16x192xf32>
    %6 = arith.addf %3, %5 : vector<16x192xf32>
    %cst_5 = arith.constant 0.000000e+00 : f32
    %7 = vector.broadcast %cst_5 : f32 to vector<16x192xf32>
    %8 = arith.maximumf %6, %7 : vector<16x192xf32>
    %9 = arith.truncf %8 : vector<16x192xf32> to vector<16x192xbf16>
    %c0_6 = arith.constant 0 : index
    %c0_7 = arith.constant 0 : index
    %10 = vector.load %arg4[%c0_6, %c0_7] : memref<192x128xbf16, #tpu.memory_space<vmem>>, vector<192x128xbf16>
    %cst_8 = arith.constant dense<0.000000e+00> : vector<16x128xf32>
    %11 = tpu.matmul %9, %10, %cst_8 {dimension_numbers = #tpu.dot_dimension_numbers<[1], [0], [0], [1], [0, 0, 1, 1], [], []>} : vector<16x192xbf16>, vector<192x128xbf16>, vector<16x128xf32> -> vector<16x128xf32>
    %c0_9 = arith.constant 0 : index
    %c0_10 = arith.constant 0 : index
    %12 = vector.load %arg5[%c0_9, %c0_10] : memref<1x128xf32, #tpu.memory_space<vmem>>, vector<1x128xf32>
    %13 = vector.broadcast %12 : vector<1x128xf32> to vector<16x128xf32>
    %14 = arith.addf %11, %13 : vector<16x128xf32>
    %15 = tpu.iota {dimensions = array<i32: 1>} : vector<16x128xi32>
    %c32_i32 = arith.constant 32 : i32
    %16 = vector.broadcast %c32_i32 : i32 to vector<16x128xi32>
    %17 = arith.cmpi sge, %15, %16 : vector<16x128xi32>
    %c40_i32 = arith.constant 40 : i32
    %18 = vector.broadcast %c40_i32 : i32 to vector<16x128xi32>
    %19 = arith.cmpi slt, %15, %18 : vector<16x128xi32>
    %20 = arith.andi %17, %19 : vector<16x128xi1>
    %c40_i32_11 = arith.constant 40 : i32
    %21 = vector.broadcast %c40_i32_11 : i32 to vector<16x128xi32>
    %22 = arith.cmpi sge, %15, %21 : vector<16x128xi32>
    %c48_i32 = arith.constant 48 : i32
    %23 = vector.broadcast %c48_i32 : i32 to vector<16x128xi32>
    %24 = arith.cmpi slt, %15, %23 : vector<16x128xi32>
    %25 = arith.andi %22, %24 : vector<16x128xi1>
    %cst_12 = arith.constant -1.000000e+30 : f32
    %26 = vector.broadcast %cst_12 : f32 to vector<16x128xf32>
    %27 = arith.select %20, %14, %26 : vector<16x128xi1>, vector<16x128xf32>
    %cst_13 = arith.constant dense<0xFF800000> : vector<16xf32>
    %28 = vector.multi_reduction <maximumf>, %27, %cst_13 [1] : vector<16x128xf32> to vector<16xf32>
    %29 = vector.shape_cast %28 : vector<16xf32> to vector<16x1xf32>
    %30 = vector.broadcast %29 : vector<16x1xf32> to vector<16x128xf32>
    %31 = arith.subf %27, %30 : vector<16x128xf32>
    %32 = math.exp %31 : vector<16x128xf32>
    %cst_14 = arith.constant dense<0.000000e+00> : vector<16xf32>
    %33 = vector.multi_reduction <add>, %32, %cst_14 [1] : vector<16x128xf32> to vector<16xf32>
    %34 = vector.shape_cast %33 : vector<16xf32> to vector<16x1xf32>
    %35 = vector.broadcast %34 : vector<16x1xf32> to vector<16x128xf32>
    %36 = arith.divf %32, %35 : vector<16x128xf32>
    %cst_15 = arith.constant -1.000000e+30 : f32
    %37 = vector.broadcast %cst_15 : f32 to vector<16x128xf32>
    %38 = arith.select %25, %14, %37 : vector<16x128xi1>, vector<16x128xf32>
    %cst_16 = arith.constant dense<0xFF800000> : vector<16xf32>
    %39 = vector.multi_reduction <maximumf>, %38, %cst_16 [1] : vector<16x128xf32> to vector<16xf32>
    %40 = vector.shape_cast %39 : vector<16xf32> to vector<16x1xf32>
    %41 = vector.broadcast %40 : vector<16x1xf32> to vector<16x128xf32>
    %42 = arith.subf %38, %41 : vector<16x128xf32>
    %43 = math.exp %42 : vector<16x128xf32>
    %cst_17 = arith.constant dense<0.000000e+00> : vector<16xf32>
    %44 = vector.multi_reduction <add>, %43, %cst_17 [1] : vector<16x128xf32> to vector<16xf32>
    %45 = vector.shape_cast %44 : vector<16xf32> to vector<16x1xf32>
    %46 = vector.broadcast %45 : vector<16x1xf32> to vector<16x128xf32>
    %47 = arith.divf %43, %46 : vector<16x128xf32>
    %48 = arith.select %25, %47, %14 : vector<16x128xi1>, vector<16x128xf32>
    %49 = arith.select %20, %36, %48 : vector<16x128xi1>, vector<16x128xf32>
    %c0_18 = arith.constant 0 : index
    %c0_19 = arith.constant 0 : index
    %50 = vector.load %arg6[%c0_18, %c0_19] : memref<16x128xf32, #tpu.memory_space<vmem>>, vector<16x128xf32>
    tpu.vector_store %arg6[%c0_18, %c0_19], %49 {strides = array<i32>} : memref<16x128xf32, #tpu.memory_space<vmem>>, vector<16x128xf32>,
    return
  }
  func.func @transform_0(%arg0: i32) -> (i32, i32) {
    %c0_i32 = arith.constant 0 : i32
    %c0_i32_0 = arith.constant 0 : i32
    return %arg0, %c0_i32 : i32, i32
  }
  func.func @transform_1(%arg0: i32) -> (i32, i32) {
    %c0_i32 = arith.constant 0 : i32
    %c0_i32_0 = arith.constant 0 : i32
    %c0_i32_1 = arith.constant 0 : i32
    return %c0_i32, %c0_i32_0 : i32, i32
  }
  func.func @transform_2(%arg0: i32) -> (i32, i32) {
    %c0_i32 = arith.constant 0 : i32
    %c0_i32_0 = arith.constant 0 : i32
    %c0_i32_1 = arith.constant 0 : i32
    return %c0_i32, %c0_i32_0 : i32, i32
  }
  func.func @transform_3(%arg0: i32) -> (i32, i32) {
    %c0_i32 = arith.constant 0 : i32
    %c0_i32_0 = arith.constant 0 : i32
    %c0_i32_1 = arith.constant 0 : i32
    return %c0_i32, %c0_i32_0 : i32, i32
  }
  func.func @transform_4(%arg0: i32) -> (i32, i32) {
    %c0_i32 = arith.constant 0 : i32
    %c0_i32_0 = arith.constant 0 : i32
    %c0_i32_1 = arith.constant 0 : i32
    return %c0_i32, %c0_i32_0 : i32, i32
  }
  func.func @transform_5(%arg0: i32) -> (i32, i32) {
    %c0_i32 = arith.constant 0 : i32
    %c0_i32_0 = arith.constant 0 : i32
    return %arg0, %c0_i32 : i32, i32
  }
}

</mosaic_0001>

<bundles_post_ra>
// kernel: full_model_forward.1
= control target key start
LH: loop header
LB: loop body
LE: loop exit
PB: predicated region body
PF: predicated region fallthrough
CT: control target
= control target key end

     0   :  { %10 = vsyncpa [#allocation3], 0  ;;  %s577_s0 = inlined_call_operand.vmem [shape: f32[16,48], index: 0, kind: input, shape index: {}]   ;;  %s578_s1 = inlined_call_operand.hbm [shape: bf16[48,192], index: 1, kind: input, shape index: {}]   ;;  %s579_s2 = inlined_call_operand.vmem [shape: f32[1,192], index: 2, kind: input, shape index: {}]   ;;  %s580_s3 = inlined_call_operand.hbm [shape: bf16[192,128], index: 3, kind: input, shape index: {}]   ;;  %s581_s4 = inlined_call_operand.vmem [shape: f32[1,128], index: 4, kind: input, shape index: {}]   ;;  %s582_s5 = inlined_call_operand.vmem [shape: f32[16,128], index: 5, kind: output, shape index: {}]  }
   0x1   :  { %11 = vsyncpa [#allocation5], 0  ;;  %s474_s18 = smov [#allocation2]   ;;  %s426_s22 = scalar_lea.hbm %s578_s1, 768 }
   0x2   :  { %s19_s19 = sshll.u32 %s474_s18, 4  ;;  %p427_p0 = scmp.ne.s32.totalorder %s578_s1, %s426_s22  ;;  %s20_s19 = int_to_ptr.vmem [resolvable:$true] %s19_s19 }
   0x3   :  { %p430_p1 = scmp.lt.u32.totalorder %s426_s22, %s578_s1 }
   0x5   :  { %p432_p2 = pnand %p430_p1, %p427_p0 }
   0x7   :  { %435 = shalt.err (!%p432_p2)
}
   0x8   :  { %s436_s27 = scalar_lea.vmem %s20_s19, 768  ;;  %p441_p4 = scmp.lt.s32.totalorder %s20_s19, %s20_s19 }
   0x9   :  { %p437_p3 = scmp.ne.s32.totalorder %s20_s19, %s436_s27  ;;  %p442_p5 = scmp.lt.s32.totalorder %s436_s27, %s436_s27 }
   0xb   :  { %p443_p6 = por %p442_p5, %p441_p4 }
   0xd   :  { %p444_p7 = pnand %p443_p6, %p437_p3 }
   0xf   :  { %447 = shalt.err (!%p444_p7)
}
  0x10   :  { %s475_s28 = smov 128   ;;  %s476_s29 = smov 8  }
  0x11   :  { %25 = dma.hbm_to_vmem [thread:$0]  %s578_s1, 768, %s20_s19, [#allocation3], %s475_s28, %s475_s28, %s476_s29  }
  0x12   :  { %s477_s7 = smov [#allocation4]   ;;  %s448_s11 = scalar_lea.hbm %s580_s3, 1536 }
  0x13   :  { %s33_s8 = sshll.u32 %s477_s7, 4  ;;  %p449_p8 = scmp.ne.s32.totalorder %s580_s3, %s448_s11  ;;  %s34_s8 = int_to_ptr.vmem [resolvable:$true] %s33_s8 }
  0x14   :  { %p452_p9 = scmp.lt.u32.totalorder %s448_s11, %s580_s3 }
  0x16   :  { %p454_p10 = pnand %p452_p9, %p449_p8 }
  0x18   :  { %457 = shalt.err (!%p454_p10)
}
  0x19   :  { %s458_s16 = scalar_lea.vmem %s34_s8, 1536  ;;  %p463_p12 = scmp.lt.s32.totalorder %s34_s8, %s34_s8 }
  0x1a   :  { %p459_p11 = scmp.ne.s32.totalorder %s34_s8, %s458_s16  ;;  %p464_p13 = scmp.lt.s32.totalorder %s458_s16, %s458_s16 }
  0x1c   :  { %p465_p0 = por %p464_p13, %p463_p12 }
  0x1e   :  { %p466_p1 = pnand %p465_p0, %p459_p11 }
  0x20   :  { %469 = shalt.err (!%p466_p1)
}
  0x21   :  { %s478_s1 = smov 64   ;;  %s479_s17 = smov 4  }
  0x22   :  { %39 = dma.hbm_to_vmem [thread:$0]  %s580_s3, 1536, %s34_s8, [#allocation5], %s478_s1, %s478_s1, %s479_s17  }
  0x23   :  { %470 = dma.done.wait [#allocation3], 768  }
  0x24   :  { %471 = vsyncadd [#allocation3], 4294966528 }
  0x25   :  { %472 = dma.done.wait [#allocation5], 1536  }
  0x26   :  { %473 = vsyncadd [#allocation5], 4294965760  ;;  %v480_v0 = vmov 0   ;;  %v389_v1 = vld [vmem:[#allocation2 + $0x4] ss:$8 sps:$4 sm:$0xff]   ;;  %v398_v8 = vld [vmem:[#allocation4] sm:$0xff]   ;;  %v60_v22 = vlaneseq }
  0x27   :  { %136 = vmatprep.mubr.bf16.mxu0 %v480_v0  ;;  %260 = vmatprep.subr.bf16.mxu1 %v480_v0  ;;  %v391_v2 = vld [vmem:[#allocation2] ss:$8 sps:$4 sm:$0xff]   ;;  %v392_v3 = vld [vmem:[#allocation2 + $0x14] ss:$8 sps:$4 sm:$0xff]   ;;  %v394_v4 = vld [vmem:[#allocation2 + $0x10] ss:$8 sps:$4 sm:$0xff]  }
  0x28   :  { %104 = vmatprep.subr.bf16.mxu0 %v389_v1  ;;  %v395_v5 = vld [vmem:[#allocation2 + $0x24] ss:$8 sps:$4 sm:$0xff]   ;;  %v397_v6 = vld [vmem:[#allocation2 + $0x20] ss:$8 sps:$4 sm:$0xff]   ;;  %261 = vmatpush1.bf16.msra.mxu1 %v398_v8  ;;  %v399_v10 = vld [vmem:[#allocation4 + $0x8] sm:$0xff]   ;;  %vm100_vm0 = vcmask 392192  }
  0x29   :  { %105 = vmatpush1.bf16.msra.mxu0 %v391_v2  ;;  %v49_v7 = vld [vmem:[%s577_s0] sm:$0xff]  ;;  %v50_v9 = vld [vmem:[%s577_s0 + $0x8] sm:$0xff]  ;;  %262 = vmatprep.subr.bf16.mxu1 %v480_v0  ;;  %v402_v14 = vld [vmem:[#allocation4 + $0x20] sm:$0xff]   ;;  %v61_v23 = vshrl.u32 %v60_v22, 7  ;;  %vm256_vm1 = vcmask 523264   ;;  %v302_v43 = vand.u32 127, %v60_v22 }
  0x2a   :  { %106 = vmatprep.subr.bf16.mxu0 %v392_v3  ;;  %v51_v11 = vpack.c.bf16 %v50_v9, %v49_v7  ;;  %v400_v12 = vld [vmem:[#allocation4 + $0x10] sm:$0xff]   ;;  %v401_v13 = vld [vmem:[#allocation4 + $0x18] sm:$0xff]   ;;  %v403_v15 = vld [vmem:[#allocation4 + $0x28] sm:$0xff]  }
  0x2b   :  { %v404_v16 = vld [vmem:[#allocation4 + $0x30] sm:$0xff]   ;;  %v405_v17 = vld [vmem:[#allocation4 + $0x38] sm:$0xff]   ;;  %v406_v18 = vld [vmem:[#allocation4 + $0x40] sm:$0xff]   ;;  %v62_v24 = vsub.s32 0, %v61_v23  ;;  %v66_v26 = vsub.s32 1, %v61_v23  ;;  %vm306_vm2 = vcmp.ge.s32.totalorder %v302_v43, 40 }
  0x2c   :  { %263 = vmatpush1.bf16.msra.mxu1 %v399_v10  ;;  %v407_v19 = vld [vmem:[#allocation4 + $0x48] sm:$0xff]   ;;  %v408_v20 = vld [vmem:[#allocation4 + $0x50] sm:$0xff]   ;;  %v409_v21 = vld [vmem:[#allocation4 + $0x58] sm:$0xff]   ;;  %vm307_vm3 = vcmp.lt.s32.totalorder %v302_v43, 48  ;;  %vm303_vm4 = vcmp.ge.s32.totalorder %v302_v43, 32  ;;  %vm304_vm5 = vcmp.lt.s32.totalorder %v302_v43, 40 }
  0x2d   :  { %107 = vmatpush1.bf16.msra.mxu0 %v394_v4  ;;  %264 = vmatprep.subr.bf16.mxu1 %v480_v0  ;;  %v58_v25 = vld [vmem:[%s579_s2] sm:$0x3]  ;;  %vm547_vm6 = vmand %vm306_vm2, %vm307_vm3 }
  0x2e   :  { %108 = vmatprep.subr.bf16.mxu0 %v395_v5  ;;  %v63_v27 = vrot.slane %v58_v25, %v62_v24  ;;  %v67_v28 = vrot.slane %v58_v25, %v66_v26  ;;  %v368_v44 = vld [vmem:[%s581_s4] ss:$0 sm:$0xff]  ;;  %vm551_vm7 = vmand %vm303_vm4, %vm304_vm5 }
  0x30   :  { %265 = vmatpush1.bf16.msra.mxu1 %v400_v12 }
  0x31   :  { %109 = vmatpush1.bf16.msra.mxu0 %v397_v6  ;;  %266 = vmatprep.subr.bf16.mxu1 %v480_v0 }
  0x34   :  { %367 = vmatmul.mubr.msk.bf16.vlgmr.msra.gmra.mrb[0].mxu0 %vm100_vm0, %v51_v11  ;;  %267 = vmatpush1.bf16.msra.mxu1 %v401_v13 }
  0x35   :  { %268 = vmatprep.subr.bf16.mxu1 %v480_v0 }
  0x38   :  { %269 = vmatpush1.bf16.msra.mxu1 %v402_v14 }
  0x39   :  { %270 = vmatprep.subr.bf16.mxu1 %v480_v0 }
  0x3c   :  { %271 = vmatpush1.bf16.msra.mxu1 %v403_v15 }
  0x3d   :  { %272 = vmatprep.subr.bf16.mxu1 %v480_v0 }
  0x40   :  { %273 = vmatpush1.bf16.msra.mxu1 %v404_v16 }
  0x41   :  { %274 = vmatprep.subr.bf16.mxu1 %v480_v0 }
  0x44   :  { %275 = vmatpush1.bf16.msra.mxu1 %v405_v17 }
  0x45   :  { %276 = vmatprep.subr.bf16.mxu1 %v480_v0 }
  0x48   :  { %277 = vmatpush1.bf16.msra.mxu1 %v406_v18 }
  0x49   :  { %278 = vmatprep.subr.bf16.mxu1 %v480_v0 }
  0x4c   :  { %279 = vmatpush1.bf16.msra.mxu1 %v407_v19 }
  0x4d   :  { %280 = vmatprep.subr.bf16.mxu1 %v480_v0 }
  0x50   :  { %281 = vmatpush1.bf16.msra.mxu1 %v408_v20 }
  0x51   :  { %282 = vmatprep.subr.bf16.mxu1 %v480_v0 }
  0x54   :  { %283 = vmatpush1.bf16.msra.mxu1 %v409_v21 }
 0x107   :  { %v138_v29 = vpop.f32.mrb[0].mxu0 }
 0x108   :  { %v139_v30 = vadd.f32 %v138_v29, %v63_v27  ;;  %v140_v31 = vpop.f32.mrb[1].mxu0 }
 0x109   :  { %v141_v32 = vadd.f32 %v140_v31, %v67_v28  ;;  %v142_v33 = vpop.f32.mrb[2].mxu0 }
 0x10a   :  { %v143_v34 = vadd.f32 %v142_v33, %v63_v27  ;;  %v144_v35 = vpop.f32.mrb[3].mxu0  ;;  %v147_v37 = vmax.f32 %v139_v30, 0.0 }
 0x10b   :  { %v145_v36 = vadd.f32 %v144_v35, %v67_v28  ;;  %v148_v39 = vmax.f32 %v141_v32, 0.0 }
 0x10c   :  { %v149_v38 = vmax.f32 %v143_v34, 0.0 }
 0x10d   :  { %v150_v40 = vmax.f32 %v145_v36, 0.0 }
 0x10e   :  { %v151_v41 = vpack.c.bf16 %v149_v38, %v147_v37 }
 0x10f   :  { %v152_v42 = vpack.c.bf16 %v150_v40, %v148_v39 }
 0x111   :  { %381 = vmatprep.mubr.msk.bf16.mxu1 %vm256_vm1, %v152_v42 }
 0x112   :  { %293 = vmatmul.mubr.bf16.vlgmr.msra.gmra.mrb[0].mxu1 %v151_v41 }
 0x1e5   :  { %v294_v46 = vpop.f32.mrb[0].mxu1 }
 0x1e6   :  { %v295_v48 = vadd.f32 %v368_v44, %v294_v46  ;;  %v296_v49 = vpop.f32.mrb[1].mxu1 }
 0x1e7   :  { %v297_v50 = vpop.f32.mrb[2].mxu1 }
 0x1e8   :  { %v298_v51 = vadd.f32 %v368_v44, %v297_v50  ;;  %v299_v52 = vpop.f32.mrb[3].mxu1  ;;  %v329_v53 = vsel %vm547_vm6, %v295_v48, -1e+30  ;;  %v309_v54 = vsel %vm551_vm7, %v295_v48, -1e+30 }
 0x1e9   :  { %331 = vmax.xlane.f32.xlu0 %v329_v53  ;;  %311 = vmax.xlane.f32.xlu1 %v309_v54 }
 0x1ea   :  { %v330_v55 = vsel %vm547_vm6, %v298_v51, -1e+30  ;;  %v310_v56 = vsel %vm551_vm7, %v298_v51, -1e+30 }
 0x1ed   :  { %333 = vmax.xlane.f32.xlu0 %v330_v55  ;;  %313 = vmax.xlane.f32.xlu1 %v310_v56 }
 0x276   :  { %v332_v57 = vpop.xlane.xlu0 %331  ;;  %v312_v58 = vpop.xlane.xlu1 %311 }
 0x277   :  { %v335_v59 = vsub.f32 %v329_v53, %v332_v57  ;;  %v315_v60 = vsub.f32 %v309_v54, %v312_v58 }
 0x279   :  { %v337_v61 = vmul.f32 1.442695, %v335_v59  ;;  %v317_v62 = vmul.f32 1.442695, %v315_v60 }
 0x27a   :  { %v334_v63 = vpop.xlane.xlu0 %333  ;;  %v314_v0 = vpop.xlane.xlu1 %313 }
 0x27b   :  { %410 = vpow2.f32 %v337_v61  ;;  %v336_v1 = vsub.f32 %v330_v55, %v334_v63  ;;  %v316_v2 = vsub.f32 %v310_v56, %v314_v0 }
 0x27c   :  { %412 = vpow2.f32 %v317_v62 }
 0x27d   :  { %v339_v3 = vmul.f32 1.442695, %v336_v1  ;;  %v319_v4 = vmul.f32 1.442695, %v316_v2 }
 0x27f   :  { %414 = vpow2.f32 %v339_v3 }
 0x280   :  { %416 = vpow2.f32 %v319_v4 }
 0x285   :  { %v411_v5 = vpop.eup %410 }
 0x286   :  { %341 = vadd.xlane.f32.xlu0 %v411_v5  ;;  %v413_v6 = vpop.eup %412 }
 0x289   :  { %v415_v7 = vpop.eup %414 }
 0x28a   :  { %343 = vadd.xlane.f32.xlu1 %v415_v7  ;;  %321 = vadd.xlane.f32.xlu0 %v413_v6  ;;  %v417_v8 = vpop.eup %416 }
 0x28e   :  { %323 = vadd.xlane.f32.xlu1 %v417_v8 }
 0x313   :  { %v342_v9 = vpop.xlane.xlu0 %341 }
 0x314   :  { %418 = vrcp.f32 %v342_v9 }
 0x317   :  { %v322_v10 = vpop.xlane.xlu0 %321  ;;  %v344_v11 = vpop.xlane.xlu1 %343 }
 0x318   :  { %420 = vrcp.f32 %v322_v10 }
 0x319   :  { %422 = vrcp.f32 %v344_v11 }
 0x31b   :  { %v324_v12 = vpop.xlane.xlu1 %323 }
 0x31c   :  { %424 = vrcp.f32 %v324_v12 }
 0x31e   :  { %v419_v13 = vpop.eup %418 }
 0x31f   :  { %v346_v14 = vmul.f32 %v419_v13, %v411_v5 }
 0x321   :  { %v349_v18 = vsel %vm547_vm6, %v346_v14, %v295_v48 }
 0x322   :  { %v421_v15 = vpop.eup %420 }
 0x323   :  { %v423_v16 = vpop.eup %422  ;;  %v326_v17 = vmul.f32 %v421_v15, %v413_v6 }
 0x324   :  { %v348_v19 = vmul.f32 %v423_v16, %v415_v7 }
 0x325   :  { %v351_v20 = vsel %vm551_vm7, %v326_v17, %v349_v18 }
 0x326   :  { %v425_v21 = vpop.eup %424  ;;  %353 = vst [vmem:[%s582_s5] sm:$0xff] %v351_v20  ;;  %v350_v23 = vsel %vm547_vm6, %v348_v19, %v298_v51 }
 0x327   :  { %v328_v22 = vmul.f32 %v425_v21, %v417_v8 }
 0x329   :  { %v352_v24 = vsel %vm551_vm7, %v328_v22, %v350_v23 }
 0x32a   :  { %354 = vst [vmem:[%s582_s5 + $0x8] sm:$0xff] %v352_v24 }
 0x32b   :  { %359 = vsyncpa [#allocation3], 1 }
 0x32c   :  { %360 = vsyncpa [#allocation5], 1 }

</bundles_post_ra>
